<compile_context>
chip_gen: v6e
topology: v6e:2x2x1
jax: 0.10.0
libtpu: 0.0.40
codegen_flags: <defaults>
</compile_context>

<pallas_src>
import jax
import jax.numpy as jnp
from jax import lax
from jax.experimental import pallas as pl
from jax.experimental.pallas import tpu as pltpu

LANE = 128
_FEATS_VMEM_BUDGET = 8 << 20  # ~8 MiB for the f32 tanh intermediate per tile


def _round_up(x, m):
    return ((x + m - 1) // m) * m


def _pick_block_q(Q, bb, Kp, H, budget=_FEATS_VMEM_BUDGET):
    """Largest query tile whose f32 tanh intermediate fits the VMEM budget."""
    if bb * Q * Kp * H * 4 <= budget or Q <= 8:
        return Q
    divisors = [t for t in range(8, Q, 8) if Q % t == 0]
    fitting = [t for t in divisors if bb * t * Kp * H * 4 <= budget]
    if fitting:
        return max(fitting)
    if divisors:
        return min(divisors)
    return Q  # TODO(synk): ragged-Q tiling for Q not divisible by 8


def additive_attention(queries, keys, values, valid_lens, wq, wk, wv):
    """Returns (output (B, Q, Dv), attention_weights (B, Q, K)).

    queries (B, Q, Dq), keys (B, K, Dk), values (B, K, Dv).
    Projection weights stored as (in_features, out_features): wq (Dq, H),
    wk (Dk, H), wv (H, 1), so projection = x @ W (== PyTorch x @ weight.T).
    valid_lens: (B,) or (B, Q) integer lengths.
    """
    B, Q, Dq = queries.shape
    _, K, Dk = keys.shape
    Dv = values.shape[-1]
    H = wq.shape[1]
    Kp = _round_up(K, LANE)      # lane-dense key axis
    Dvp = _round_up(Dv, LANE)    # lane-dense value-feature axis

    # ---- XLA-side layout plumbing: bf16 cast, conditional lane padding.
    queries_b = queries.astype(jnp.bfloat16)
    keys_b = keys.astype(jnp.bfloat16)
    if Kp != K:
        keys_b = jnp.pad(keys_b, ((0, 0), (0, Kp - K), (0, 0)))
    vals_b = values.astype(jnp.bfloat16)
    if Kp != K or Dvp != Dv:
        vals_b = jnp.pad(vals_b, ((0, 0), (0, Kp - K), (0, Dvp - Dv)))
    wq_b = wq.astype(jnp.bfloat16)
    wk_b = wk.astype(jnp.bfloat16)
    wv_row = wv.reshape(1, H).astype(jnp.float32)   # stays f32 (VPU path)

    vl = valid_lens
    if vl.ndim == 1:
        vl = jnp.broadcast_to(vl[:, None], (B, Q))  # == repeat_interleave(vl, Q)
    valid3 = vl.reshape(B, Q, 1).astype(jnp.int32)

    # ---- Tiling: parallel over batch and query tiles (v7x: 2 TensorCores).
    block_b = 1
    block_q = _pick_block_q(Q, block_b, Kp, H)
    grid = (pl.cdiv(B, block_b), pl.cdiv(Q, block_q))

    def kernel(q_ref, k_ref, v_ref, valid_ref, wq_ref, wk_ref, wv_ref,
               out_ref, attn_ref):
        bb, tq = q_ref.shape[0], q_ref.shape[1]
        rows = bb * tq

        # Projections on the MXU: bf16 operands, f32 accumulation.
        qp = jnp.dot(q_ref[...], wq_ref[...],
                     preferred_element_type=jnp.float32)          # (bb, tq, H)
        kp = jnp.dot(k_ref[...], wk_ref[...],
                     preferred_element_type=jnp.float32)          # (bb, Kp, H)

        # features = tanh(q[:, :, None, :] + k[:, None, :, :])    (bb, tq, Kp, H)
        feats = jnp.tanh(qp[:, :, None, :] + kp[:, None, :, :])
        feats = feats.reshape(rows, Kp, H)                        # flatten rows

        # scores = w_v(features): VPU multiply + minor-dim reduce over H
        # (no per-row MXU weight pushes).
        scores = jnp.sum(feats * wv_ref[...].reshape(1, 1, H), axis=-1)  # (rows, Kp)

        # masked softmax along keys (sequence_mask with -1e6 fill), f32 math.
        col = lax.broadcasted_iota(jnp.int32, (rows, Kp), 1)
        mask = col < valid_ref[...].reshape(rows, 1)
        scores = jnp.where(mask, scores, jnp.float32(-1000000.0))

        m = jnp.max(scores, axis=-1, keepdims=True)
        e = jnp.exp(scores - m)
        denom = jnp.sum(e, axis=-1, keepdims=True)                # >= 1 always
        inv = pl.reciprocal(denom, approx=True)                   # EUP slot
        inv = inv * (2.0 - denom * inv)                           # 1 Newton step
        attn = e * inv                                            # (rows, Kp)

        attn_ref[...] = attn.reshape(bb, tq, Kp).astype(attn_ref.dtype)

        # dropout (eval mode) is identity; one batched bmm on the MXU, one store.
        out = jnp.einsum('bqk,bkd->bqd',
                         attn.reshape(bb, tq, Kp).astype(jnp.bfloat16),
                         v_ref[...],
                         preferred_element_type=jnp.float32)      # (bb, tq, Dvp)
        out_ref[...] = out.astype(out_ref.dtype)

    out_pad, attn_pad = pl.pallas_call(
        kernel,
        out_shape=(
            jax.ShapeDtypeStruct((B, Q, Dvp), jnp.float32),
            jax.ShapeDtypeStruct((B, Q, Kp), jnp.float32),
        ),
        grid=grid,
        in_specs=[
            pl.BlockSpec((block_b, block_q, Dq), lambda bi, qi: (bi, qi, 0)),
            pl.BlockSpec((block_b, Kp, Dk), lambda bi, qi: (bi, 0, 0)),
            pl.BlockSpec((block_b, Kp, Dvp), lambda bi, qi: (bi, 0, 0)),
            pl.BlockSpec((block_b, block_q, 1), lambda bi, qi: (bi, qi, 0)),
            pl.BlockSpec((Dq, H), lambda bi, qi: (0, 0)),
            pl.BlockSpec((Dk, H), lambda bi, qi: (0, 0)),
            pl.BlockSpec((1, H), lambda bi, qi: (0, 0)),
        ],
        out_specs=(
            pl.BlockSpec((block_b, block_q, Dvp), lambda bi, qi: (bi, qi, 0)),
            pl.BlockSpec((block_b, block_q, Kp), lambda bi, qi: (bi, qi, 0)),
        ),
        compiler_params=pltpu.CompilerParams(
            dimension_semantics=("parallel", "parallel"),
            vmem_limit_bytes=48 * 1024 * 1024,
        ),
    )(queries_b, keys_b, vals_b, valid3, wq_b, wk_b, wv_row)

    out = out_pad[:, :, :Dv]
    attn = attn_pad[:, :, :K]
    return out, attn


def reference_additive_attention(queries, keys, values, valid_lens, wq, wk, wv):
    qp = queries @ wq                                              # (B, Q, H)
    kp = keys @ wk                                                 # (B, K, H)
    feats = jnp.tanh(qp[:, :, None, :] + kp[:, None, :, :])        # (B, Q, K, H)
    scores = jnp.squeeze(feats @ wv, -1)                           # (B, Q, K)
    kk = jnp.arange(scores.shape[-1])
    if valid_lens.ndim == 1:
        vl = valid_lens[:, None, None]
    else:
        vl = valid_lens[:, :, None]
    mask = kk[None, None, :] < vl
    scores = jnp.where(mask, scores, -1000000.0)
    attn = jax.nn.softmax(scores, axis=-1)
    return attn @ values, attn


if __name__ == "__main__":
    # Small shapes consistent with the module's forward.
    B, Q, K = 2, 4, 8
    query_size, key_size, num_hiddens, value_dim = 32, 16, 32, 32

    root = jax.random.PRNGKey(0)
    kq, kk_, kv, kwq, kwk, kwv = jax.random.split(root, 6)

    queries = jax.random.normal(kq, (B, Q, query_size), dtype=jnp.float32)
    keys = jax.random.normal(kk_, (B, K, key_size), dtype=jnp.float32)
    values = jax.random.normal(kv, (B, K, value_dim), dtype=jnp.float32)
    valid_lens = jnp.array([3, 6], dtype=jnp.int32)

    # Deterministic parameter init (nn.Linear shapes; stored transposed).
    w_q = jax.random.normal(kwq, (query_size, num_hiddens), dtype=jnp.float32) * 0.1
    w_k = jax.random.normal(kwk, (key_size, num_hiddens), dtype=jnp.float32) * 0.1
    w_v = jax.random.normal(kwv, (num_hiddens, 1), dtype=jnp.float32) * 0.1

    out, attn = additive_attention(queries, keys, values, valid_lens, w_q, w_k, w_v)
    out = jax.block_until_ready(out)
    attn = jax.block_until_ready(attn)

    ref_out, ref_attn = reference_additive_attention(
        queries, keys, values, valid_lens, w_q, w_k, w_v)

    # bf16 MXU operands (per perf review) -> tolerance looser than pure-f32;
    # mask/softmax math stays f32.
    TOL = dict(atol=4e-2, rtol=4e-2)
    assert out.shape == (B, Q, value_dim)
    assert attn.shape == (B, Q, K)
    assert jnp.allclose(out, ref_out, **TOL)
    assert jnp.allclose(attn, ref_attn, **TOL)

    # Per-query (B, Q) valid_lens path (d2l's masked_softmax also supports this).
    vl2 = jnp.array([[1, 2, 3, 4], [2, 4, 6, 8]], dtype=jnp.int32)
    out2, attn2 = additive_attention(queries, keys, values, vl2, w_q, w_k, w_v)
    out2 = jax.block_until_ready(out2)
    attn2 = jax.block_until_ready(attn2)
    ref_out2, ref_attn2 = reference_additive_attention(
        queries, keys, values, vl2, w_q, w_k, w_v)
    assert jnp.allclose(out2, ref_out2, **TOL)
    assert jnp.allclose(attn2, ref_attn2, **TOL)

    print("KERNEL_OK")
</pallas_src>

<mosaic_0001>
module attributes {stable_mosaic.version = 11 : i64} {
  func.func @kernel(%arg0: i32, %arg1: i32, %arg2: memref<1x4x32xbf16, #tpu.memory_space<vmem>>, %arg3: memref<1x128x16xbf16, #tpu.memory_space<vmem>>, %arg4: memref<1x128x128xbf16, #tpu.memory_space<vmem>>, %arg5: memref<1x4x1xi32, #tpu.memory_space<vmem>>, %arg6: memref<32x32xbf16, #tpu.memory_space<vmem>>, %arg7: memref<16x32xbf16, #tpu.memory_space<vmem>>, %arg8: memref<1x32xf32, #tpu.memory_space<vmem>>, %arg9: memref<1x4x128xf32, #tpu.memory_space<vmem>>, %arg10: memref<1x4x128xf32, #tpu.memory_space<vmem>>) attributes {dimension_semantics = [#tpu.dimension_semantics<parallel>, #tpu.dimension_semantics<parallel>], iteration_bounds = array<i64: 2, 1>, scalar_prefetch = 0 : i64, scratch_operands = 0 : i64, tpu.core_type = #tpu.core_type<tc>, window_params = [{transform_indices = @transform_0, window_bounds = array<i64: 1, 4, 32>}, {transform_indices = @transform_1, window_bounds = array<i64: 1, 128, 16>}, {transform_indices = @transform_2, window_bounds = array<i64: 1, 128, 128>}, {transform_indices = @transform_3, window_bounds = array<i64: 1, 4, 1>}, {pipeline_mode = #tpu.pipeline_mode<synchronous>, transform_indices = @transform_4, window_bounds = array<i64: 32, 32>}, {pipeline_mode = #tpu.pipeline_mode<synchronous>, transform_indices = @transform_5, window_bounds = array<i64: 16, 32>}, {pipeline_mode = #tpu.pipeline_mode<synchronous>, transform_indices = @transform_6, window_bounds = array<i64: 1, 32>}, {transform_indices = @transform_7, window_bounds = array<i64: 1, 4, 128>}, {transform_indices = @transform_8, window_bounds = array<i64: 1, 4, 128>}]} {
    %c0 = arith.constant 0 : index
    %c0_0 = arith.constant 0 : index
    %c0_1 = arith.constant 0 : index
    %0 = vector.load %arg2[%c0, %c0_0, %c0_1] : memref<1x4x32xbf16, #tpu.memory_space<vmem>>, vector<1x4x32xbf16>
    %c0_2 = arith.constant 0 : index
    %c0_3 = arith.constant 0 : index
    %1 = vector.load %arg6[%c0_2, %c0_3] : memref<32x32xbf16, #tpu.memory_space<vmem>>, vector<32x32xbf16>
    %cst = arith.constant dense<0.000000e+00> : vector<1x4x32xf32>
    %2 = tpu.matmul %0, %1, %cst {dimension_numbers = #tpu.dot_dimension_numbers<[2], [0], [0, 1], [1], [0, 0, 0, 1, 1, 1], [], []>} : vector<1x4x32xbf16>, vector<32x32xbf16>, vector<1x4x32xf32> -> vector<1x4x32xf32>
    %c0_4 = arith.constant 0 : index
    %c0_5 = arith.constant 0 : index
    %c0_6 = arith.constant 0 : index
    %3 = vector.load %arg3[%c0_4, %c0_5, %c0_6] : memref<1x128x16xbf16, #tpu.memory_space<vmem>>, vector<1x128x16xbf16>
    %c0_7 = arith.constant 0 : index
    %c0_8 = arith.constant 0 : index
    %4 = vector.load %arg7[%c0_7, %c0_8] : memref<16x32xbf16, #tpu.memory_space<vmem>>, vector<16x32xbf16>
    %cst_9 = arith.constant dense<0.000000e+00> : vector<1x128x32xf32>
    %5 = tpu.matmul %3, %4, %cst_9 {dimension_numbers = #tpu.dot_dimension_numbers<[2], [0], [0, 1], [1], [0, 0, 0, 1, 1, 1], [], []>} : vector<1x128x16xbf16>, vector<16x32xbf16>, vector<1x128x32xf32> -> vector<1x128x32xf32>
    %6 = vector.shape_cast %2 : vector<1x4x32xf32> to vector<1x4x1x32xf32>
    %7 = vector.shape_cast %5 : vector<1x128x32xf32> to vector<1x1x128x32xf32>
    %8 = vector.broadcast %6 : vector<1x4x1x32xf32> to vector<1x4x128x32xf32>
    %9 = vector.broadcast %7 : vector<1x1x128x32xf32> to vector<1x4x128x32xf32>
    %10 = arith.addf %8, %9 : vector<1x4x128x32xf32>
    %11 = math.tanh %10 : vector<1x4x128x32xf32>
    %12 = vector.shape_cast %11 : vector<1x4x128x32xf32> to vector<4x128x32xf32>
    %c0_10 = arith.constant 0 : index
    %c0_11 = arith.constant 0 : index
    %13 = vector.load %arg8[%c0_10, %c0_11] : memref<1x32xf32, #tpu.memory_space<vmem>>, vector<1x32xf32>
    %14 = vector.shape_cast %13 : vector<1x32xf32> to vector<1x1x32xf32>
    %15 = vector.broadcast %14 : vector<1x1x32xf32> to vector<4x128x32xf32>
    %16 = arith.mulf %12, %15 : vector<4x128x32xf32>
    %cst_12 = arith.constant dense<0.000000e+00> : vector<4x128xf32>
    %17 = vector.multi_reduction <add>, %16, %cst_12 [2] : vector<4x128x32xf32> to vector<4x128xf32>
    %18 = tpu.iota {dimensions = array<i32: 1>} : vector<4x128xi32>
    %c0_13 = arith.constant 0 : index
    %c0_14 = arith.constant 0 : index
    %c0_15 = arith.constant 0 : index
    %19 = vector.load %arg5[%c0_13, %c0_14, %c0_15] : memref<1x4x1xi32, #tpu.memory_space<vmem>>, vector<1x4x1xi32>
    %20 = vector.shape_cast %19 : vector<1x4x1xi32> to vector<4x1xi32>
    %21 = vector.broadcast %20 : vector<4x1xi32> to vector<4x128xi32>
    %22 = arith.cmpi slt, %18, %21 : vector<4x128xi32>
    %cst_16 = arith.constant -1.000000e+06 : f32
    %23 = vector.broadcast %cst_16 : f32 to vector<4x128xf32>
    %24 = arith.select %22, %17, %23 : vector<4x128xi1>, vector<4x128xf32>
    %cst_17 = arith.constant dense<0xFF800000> : vector<4xf32>
    %25 = vector.multi_reduction <maximumf>, %24, %cst_17 [1] : vector<4x128xf32> to vector<4xf32>
    %26 = vector.shape_cast %25 : vector<4xf32> to vector<4x1xf32>
    %27 = vector.broadcast %26 : vector<4x1xf32> to vector<4x128xf32>
    %28 = arith.subf %24, %27 : vector<4x128xf32>
    %29 = math.exp %28 : vector<4x128xf32>
    %cst_18 = arith.constant dense<0.000000e+00> : vector<4xf32>
    %30 = vector.multi_reduction <add>, %29, %cst_18 [1] : vector<4x128xf32> to vector<4xf32>
    %31 = vector.shape_cast %30 : vector<4xf32> to vector<4x1xf32>
    %32 = tpu.reciprocal %31 {approx = true} : vector<4x1xf32> -> vector<4x1xf32>
    %33 = arith.mulf %31, %32 : vector<4x1xf32>
    %cst_19 = arith.constant 2.000000e+00 : f32
    %34 = vector.broadcast %cst_19 : f32 to vector<4x1xf32>
    %35 = arith.subf %34, %33 : vector<4x1xf32>
    %36 = arith.mulf %32, %35 : vector<4x1xf32>
    %37 = vector.broadcast %36 : vector<4x1xf32> to vector<4x128xf32>
    %38 = arith.mulf %29, %37 : vector<4x128xf32>
    %39 = vector.shape_cast %38 : vector<4x128xf32> to vector<1x4x128xf32>
    %c0_20 = arith.constant 0 : index
    %c0_21 = arith.constant 0 : index
    %c0_22 = arith.constant 0 : index
    %40 = vector.load %arg10[%c0_20, %c0_21, %c0_22] : memref<1x4x128xf32, #tpu.memory_space<vmem>>, vector<1x4x128xf32>
    tpu.vector_store %arg10[%c0_20, %c0_21, %c0_22], %39 {strides = array<i32>} : memref<1x4x128xf32, #tpu.memory_space<vmem>>, vector<1x4x128xf32>,
    %41 = vector.shape_cast %38 : vector<4x128xf32> to vector<1x4x128xf32>
    %42 = arith.truncf %41 : vector<1x4x128xf32> to vector<1x4x128xbf16>
    %c0_23 = arith.constant 0 : index
    %c0_24 = arith.constant 0 : index
    %c0_25 = arith.constant 0 : index
    %43 = vector.load %arg4[%c0_23, %c0_24, %c0_25] : memref<1x128x128xbf16, #tpu.memory_space<vmem>>, vector<1x128x128xbf16>
    "tpu.trace_start"() <{level = 10 : i32, message = "bqk,bkd->bqd"}> : () -> ()
    %cst_26 = arith.constant dense<0.000000e+00> : vector<1x4x128xf32>
    %44 = tpu.matmul %42, %43, %cst_26 {dimension_numbers = #tpu.dot_dimension_numbers<[2], [1], [1], [2], [0, 0, 0, 1, 1, 2], [0], [0]>} : vector<1x4x128xbf16>, vector<1x128x128xbf16>, vector<1x4x128xf32> -> vector<1x4x128xf32>
    "tpu.trace_stop"() : () -> ()
    %c0_27 = arith.constant 0 : index
    %c0_28 = arith.constant 0 : index
    %c0_29 = arith.constant 0 : index
    %45 = vector.load %arg9[%c0_27, %c0_28, %c0_29] : memref<1x4x128xf32, #tpu.memory_space<vmem>>, vector<1x4x128xf32>
    tpu.vector_store %arg9[%c0_27, %c0_28, %c0_29], %44 {strides = array<i32>} : memref<1x4x128xf32, #tpu.memory_space<vmem>>, vector<1x4x128xf32>,
    return
  }
  func.func @transform_0(%arg0: i32, %arg1: i32) -> (i32, i32, i32) {
    %c0_i32 = arith.constant 0 : i32
    %c0_i32_0 = arith.constant 0 : i32
    return %arg0, %arg1, %c0_i32 : i32, i32, i32
  }
  func.func @transform_1(%arg0: i32, %arg1: i32) -> (i32, i32, i32) {
    %c0_i32 = arith.constant 0 : i32
    %c0_i32_0 = arith.constant 0 : i32
    %c0_i32_1 = arith.constant 0 : i32
    return %arg0, %c0_i32, %c0_i32_0 : i32, i32, i32
  }
  func.func @transform_2(%arg0: i32, %arg1: i32) -> (i32, i32, i32) {
    %c0_i32 = arith.constant 0 : i32
    %c0_i32_0 = arith.constant 0 : i32
    %c0_i32_1 = arith.constant 0 : i32
    return %arg0, %c0_i32, %c0_i32_0 : i32, i32, i32
  }
  func.func @transform_3(%arg0: i32, %arg1: i32) -> (i32, i32, i32) {
    %c0_i32 = arith.constant 0 : i32
    %c0_i32_0 = arith.constant 0 : i32
    return %arg0, %arg1, %c0_i32 : i32, i32, i32
  }
  func.func @transform_4(%arg0: i32, %arg1: i32) -> (i32, i32) {
    %c0_i32 = arith.constant 0 : i32
    %c0_i32_0 = arith.constant 0 : i32
    %c0_i32_1 = arith.constant 0 : i32
    return %c0_i32, %c0_i32_0 : i32, i32
  }
  func.func @transform_5(%arg0: i32, %arg1: i32) -> (i32, i32) {
    %c0_i32 = arith.constant 0 : i32
    %c0_i32_0 = arith.constant 0 : i32
    %c0_i32_1 = arith.constant 0 : i32
    return %c0_i32, %c0_i32_0 : i32, i32
  }
  func.func @transform_6(%arg0: i32, %arg1: i32) -> (i32, i32) {
    %c0_i32 = arith.constant 0 : i32
    %c0_i32_0 = arith.constant 0 : i32
    %c0_i32_1 = arith.constant 0 : i32
    return %c0_i32, %c0_i32_0 : i32, i32
  }
  func.func @transform_7(%arg0: i32, %arg1: i32) -> (i32, i32, i32) {
    %c0_i32 = arith.constant 0 : i32
    %c0_i32_0 = arith.constant 0 : i32
    return %arg0, %arg1, %c0_i32 : i32, i32, i32
  }
  func.func @transform_8(%arg0: i32, %arg1: i32) -> (i32, i32, i32) {
    %c0_i32 = arith.constant 0 : i32
    %c0_i32_0 = arith.constant 0 : i32
    return %arg0, %arg1, %c0_i32 : i32, i32, i32
  }
}

</mosaic_0001>

<bundles_post_ra>
// kernel: tpu_custom_call.1
= control target key start
LH: loop header
LB: loop body
LE: loop exit
PB: predicated region body
PF: predicated region fallthrough
CT: control target
= control target key end

     0   :  { %s3079_s0 = inlined_call_operand.vmem [shape: bf16[2,4,32], index: 0, kind: input, shape index: {}]   ;;  %s3080_s1 = inlined_call_operand.vmem [shape: bf16[2,128,16], index: 1, kind: input, shape index: {}]   ;;  %s3081_s2 = inlined_call_operand.vmem [shape: bf16[2,128,128], index: 2, kind: input, shape index: {}]   ;;  %s3082_s3 = inlined_call_operand.vmem [shape: s32[2,4,1], index: 3, kind: input, shape index: {}]   ;;  %s3083_s4 = inlined_call_operand.vmem [shape: bf16[32,32], index: 4, kind: input, shape index: {}]   ;;  %s3084_s5 = inlined_call_operand.vmem [shape: bf16[16,32], index: 5, kind: input, shape index: {}]   ;;  %s3085_s6 = inlined_call_operand.vmem [shape: f32[1,32], index: 6, kind: input, shape index: {}]   ;;  %s3086_s7 = inlined_call_operand.hbm [shape: f32[2,4,128], index: 7, kind: output, shape index: {0}]   ;;  %s3087_s8 = inlined_call_operand.hbm [shape: f32[2,4,128], index: 8, kind: output, shape index: {1}]  }
   0x1   :  { %3090 = sst [smem:[#allocation8_spill]] %s3079_s0 }
   0x2   :  { %3091 = sst [smem:[#allocation9_spill]] %s3080_s1 }
   0x3   :  { %14 = vsyncpa [#allocation3], 0 }
   0x4   :  { %16 = vsyncpa [#allocation3 + $0x1], 0 }
   0x5   :  { %17 = vsyncpa [#allocation5], 0 }
   0x6   :  { %19 = vsyncpa [#allocation5 + $0x1], 0  ;;  %s2307_s27 = smov 0   ;;  %s2309_s28 = smov 0  }
   0x7   :  { %s2311_s29 = smov 0   ;;  %s2313_s30 = smov 0  }
   0x8   :  { %s2315_s9 = smov 0   ;;  %s2317_s10 = smov 0  }
   0x9 LB: > { %s1815_s11 = sadd.s32 4294967295, %s2254_s10   ;;  %s1816_s12 = sadd.s32 4294967294, %s2254_s10   ;;  %s2254_s10 = sphi %s2317_s10, %s25_s10   ;;  %s2250_s9 = sphi %s2315_s9, %s3102_s9   ;;  %s2246_s30 = sphi %s2313_s30, %s3101_s30   ;;  %s2242_s29 = sphi %s2311_s29, %s3100_s29   ;;  %s2238_s28 = sphi %s2309_s28, %s3099_s28   ;;  %s2234_s27 = sphi %s2307_s27, %s3098_s27  }
   0xa   : > { %s37_s13 = sadd.s32 1, %s2250_s9  ;;  %s217_s14 = sadd.s32 1, %s2242_s29 }
   0xb   : > { %p39_p0 = scmp.ge.s32.totalorder %s37_s13, 2  ;;  %p227_p1 = scmp.ne.s32.totalorder %s2242_s29, %s2238_s28 }
   0xc   : > { %p228_p2 = scmp.eq.s32.totalorder %s1815_s11, 1  ;;  %p233_p3 = scmp.ne.s32.totalorder %s2238_s28, %s2234_s27 }
   0xd   : > { %s3104_s13 = smov (%p39_p0, %s37_s13), 0  ;;  %p234_p5 = scmp.eq.s32.totalorder %s1816_s12, 1 }
   0xe   : > { %p2347_p4 = por %p228_p2, %p227_p1  ;;  %s212_s16 = ssub.s32 %s2250_s9, %s3104_s13 }
   0xf   : > { %p1819_p6 = scmp.ge.s32.totalorder %s2254_s10, 1  ;;  %p215_p7 = scmp.eq.s32.totalorder %s212_s16, 0 }
  0x10   : > { %p2354_p8 = por %p234_p5, %p233_p3  ;;  %p325_p9 = scmp.lt.s32.totalorder %s2254_s10, 3 }
  0x11   : > { %s2360_s18 = scalar_select %p215_p7, %s2242_s29, %s217_s14  }
  0x12   : > { %p326_p10 = pnand %p1819_p6, %p325_p9 }
  0x13   : > { %p383_p11 = scmp.lt.s32.totalorder (!%p326_p10), %s2246_s30, 1  ;;  %s3094_s1 = sld [smem:[#allocation9_spill]] (!%p326_p10) }
  0x14   : > { %329 = sbr.rel (%p326_p10) target bundleno = 1056 (0x420), region = 48  ;;  %s3095_s0 = sld [smem:[#allocation8_spill]] (!%p326_p10) }
  0x15   : > { %s3089_s22 = sshll.u32 (!%p326_p10), %s2246_s30, 6 }
  0x19   : > { %v1997_v0 = vld [vmem:[%s3083_s4 + $0x8] sm:$0xff]   ;;  %v2256_v1 = vmov 0.0   ;;  %v1998_v2 = vld [vmem:[%s3084_s5] sm:$0xff]   ;;  %vm2257_vm0 = vmmov 0   ;;  %s2377_s25 = scalar_select %p383_p11, %s2246_s30, 1  ;;  %vm533_vm1 = vcmask 130048   ;;  %v659_v15 = vlaneseq }
  0x1a   : > { %1886 = vmatprep.subr.bf16.mxu0 %v2256_v1  ;;  %v1999_v3 = vld [vmem:[%s3083_s4] sm:$0xff]   ;;  %1890 = vmatprep.mubr.msk.bf16.mxu0 %vm2257_vm0, %v2256_v1  ;;  %vm425_vm2 = vcmask 261120   ;;  %v2258_v13 = vmov 1966171168   ;;  %vm1171_vm3 = vcmask 130112   ;;  %vm1178_vm4 = vcmask 195712  }
  0x1b   : > { %1887 = vmatpush3.bf16.msra.mxu0 %v1997_v0  ;;  %1894 = vmatprep.subr.bf16.mxu1 %v1998_v2  ;;  %s1863_s26 = sshll.u32 %s2377_s25, 6  ;;  %s1822_s11 = sshll.u32 %s2377_s25, 1  ;;  %v657_v14 = vunpack.c.l.s4 %v2258_v13  ;;  %v2405_v17 = vshrl.u32 %v659_v15, 7  ;;  %v2431_v51 = vld [vmem:[%s3085_s6] ss:$0 sm:$0xff]  ;;  %vm1185_vm5 = vcmask 261312  }
  0x1c   : > { %1888 = vmatprep.subr.bf16.mxu0 %v2256_v1  ;;  %1895 = vmatpush3.bf16.msra.mxu1 %v1998_v2  ;;  %s394_s16 = scalar_lea.vmem %s3094_s1, %s1863_s26  ;;  %s389_s21 = scalar_lea.vmem %s3095_s0, %s1822_s11  ;;  %vm1192_vm6 = vcmask 326912   ;;  %vm1199_vm7 = vcmask 392512   ;;  %vm1206_vm8 = vcmask 458112   ;;  %vm1213_vm9 = vcmask 523712  }
  0x1d   : > { %1912 = vmatprep.subr.bf16.mxu1 %v2256_v1  ;;  %v2000_v4 = vld [vmem:[%s394_s16] sm:$0xff]   ;;  %v2001_v6 = vld [vmem:[%s394_s16 + $0x8] sm:$0xff]   ;;  %v2002_v7 = vld [vmem:[%s394_s16 + $0x10] sm:$0xff]   ;;  %s2395_s24 = scalar_lea.vmem %s3081_s2, %s1863_s26  ;;  %v658_v16 = vunpack.c.0.s8 %v657_v14  ;;  %v682_v21 = vsub.s32 0, %v2405_v17  ;;  %s1827_s12 = sshll.u32 %s2377_s25, 2  ;;  %vm1220_vm10 = vcmask 589312  }
  0x1e   : > { %v408_v5 = vld [vmem:[%s389_s21] sm:$0x3]  ;;  %1896 = vmatprep.mubr.msk.bf16.mxu1 %vm533_vm1, %v2000_v4  ;;  %v2003_v8 = vld [vmem:[%s394_s16 + $0x18] sm:$0xff]   ;;  %v2005_v10 = vld [vmem:[%s394_s16 + $0x28] sm:$0xff]   ;;  %s406_s19 = scalar_lea.vmem %s3082_s3, %s1827_s12  ;;  %vm1227_vm11 = vcmask 654912   ;;  %vm1234_vm12 = vcmask 720512   ;;  %s1670_s26 = scalar_lea.hbm %s3087_s8, %s3089_s22 }
  0x1f   : > { %1889 = vmatpush3.bf16.msra.mxu0 %v1999_v3  ;;  %1897 = vmatmul.mubr.msk.bf16.vlgmr.msra.gmra.mxu1 %vm533_vm1, %v2001_v6  ;;  %v2004_v9 = vld [vmem:[%s394_s16 + $0x20] sm:$0xff]   ;;  %v2006_v11 = vld [vmem:[%s394_s16 + $0x30] sm:$0xff]   ;;  %v2007_v12 = vld [vmem:[%s394_s16 + $0x38] sm:$0xff]   ;;  %v661_v18 = vsub.s32 %v658_v16, %v2405_v17  ;;  %vm1241_vm13 = vcmask 786112   ;;  %vm1248_vm14 = vcmask 851712   ;;  %vm1255_vm15 = vcmask 917312  }
  0x20   : > { %1900 = vmatprep.mubr.msk.bf16.mxu1 %vm533_vm1, %v2002_v7  ;;  %s3001_s25 = sand.u32 1, %s2238_s28   ;;  %s2260_s16 = smov [#allocation4]  }
  0x21   : > { %s3088_s20 = sshll.u32 %s3001_s25, 2  ;;  %s1644_s12 = scalar_lea.sflag [#allocation5], %s3001_s25 }
  0x22   : > { %1891 = vmatmul.mubr.msk.bf16.vlgmr.msra.gmra.mxu0 %vm425_vm2, %v408_v5  ;;  %s382_s21 = scalar_lea.vmem [#allocation4], %s3088_s20 }
  0x23   : > { %s1672_s11 = sshll.u32 %s382_s21, 4  ;;  %s1673_s11 = int_to_ptr.vmem [resolvable:$true] %s1672_s11 }
  0x24   : > { %s2148_s14 = scalar_lea.vmem %s1673_s11, 64 }
  0x25   : > { %p2149_p12 = scmp.ne.s32.totalorder %s1673_s11, %s2148_s14 }
  0x27   : > { %1901 = vmatmul.mubr.msk.bf16.gmra.mxu1 %vm533_vm1, %v2003_v8  ;;  %p2150_p13 = pnand %p2149_p12, %p2347_p4 }
  0x28   : > { %1904 = vmatprep.mubr.msk.bf16.mxu1 %vm533_vm1, %v2004_v9 }
  0x29   : > { %p2151_p0 = pneg %p2150_p13 }
  0x2f   : > { %1905 = vmatmul.mubr.msk.bf16.gmra.mxu1 %vm533_vm1, %v2005_v10 }
  0x30   : > { %1908 = vmatprep.mubr.msk.bf16.mxu1 %vm533_vm1, %v2006_v11 }
  0x37   : > { %1909 = vmatmul.mubr.msk.bf16.gmra.mxu1 %vm533_vm1, %v2007_v12  ;;  %vm1269_vm1 = vcmask 1048512  }
  0x38   : > { %1928 = vmatprep.mubr.msk.bf16.mxu1 %vm2257_vm0, %v2256_v1  ;;  %vm1262_vm0 = vcmask 982912  }
  0xdf   : > { %v1898_v22 = vpop.f32.mrf.mxu1 }
  0xe1   : > { %v592_v29 = vpop.f32.mrf.mxu1 }
  0xe2   : > { %v463_v19 = vpop.f32.mrf.mxu0 }
  0xe3   : > { %v662_v20 = vrot.slane %v463_v19, %v661_v18  ;;  %v1899_v35 = vpop.f32.mrf.mxu1 }
  0xe4   : > { %v1892_v23 = vpop.f32.mrf.mxu0 }
  0xe5   : > { %v663_v24 = vcombine.high %v662_v20, %v662_v20  ;;  %v670_v25 = vrot.slane %v662_v20, %v661_v18  ;;  %v595_v40 = vpop.f32.mrf.mxu1 }
  0xe6   : > { %v466_v26 = vpop.f32.mrf.mxu0 }
  0xe7   : > { %v677_v27 = vrot.slane %v663_v24, %v661_v18  ;;  %v2409_v28 = vrot.slane %v670_v25, %v682_v21  ;;  %v678_v31 = vcombine.high %v670_v25, %v670_v25  ;;  %v1902_v45 = vpop.f32.mrf.mxu1 }
  0xe8   : > { %v1893_v30 = vpop.f32.mrf.mxu0 }
  0xe9   : > { %v2411_v32 = vrot.slane %v677_v27, %v682_v21  ;;  %v679_v33 = vcombine.high %v677_v27, %v677_v27  ;;  %v700_v34 = vadd.f32 %v2409_v28, %v592_v29  ;;  %v2415_v37 = vrot.slane %v678_v31, %v682_v21  ;;  %v608_v50 = vpop.f32.mrf.mxu1 }
  0xea   : > { %v702_v39 = vadd.f32 %v1898_v22, %v2409_v28  ;;  %v701_v44 = vadd.f32 %v2409_v28, %v595_v40  ;;  %v703_v49 = vadd.f32 %v1899_v35, %v2409_v28  ;;  %v706_v62 = vadd.f32 %v1902_v45, %v2409_v28 }
  0xeb   : > { %v716_v36 = vadd.f32 %v2411_v32, %v592_v29  ;;  %2016 = vtanh.f32 %v700_v34  ;;  %v2417_v38 = vrot.slane %v679_v33, %v682_v21  ;;  %v718_v41 = vadd.f32 %v1898_v22, %v2411_v32  ;;  %v2438_v58 = vpop.f32.mrf.mxu1 }
  0xec   : > { %v734_v42 = vadd.f32 %v1898_v22, %v2415_v37  ;;  %v717_v46 = vadd.f32 %v2411_v32, %v595_v40  ;;  %v732_v47 = vadd.f32 %v2415_v37, %v592_v29  ;;  %v733_v52 = vadd.f32 %v2415_v37, %v595_v40 }
  0xed   : > { %2018 = vtanh.f32 %v716_v36  ;;  %v750_v43 = vadd.f32 %v1898_v22, %v2417_v38  ;;  %v748_v48 = vadd.f32 %v2417_v38, %v592_v29  ;;  %v719_v54 = vadd.f32 %v1899_v35, %v2411_v32  ;;  %v2446_v3 = vpop.f32.mrf.mxu1 }
  0xee   : > { %2020 = vtanh.f32 %v702_v39  ;;  %v735_v55 = vadd.f32 %v1899_v35, %v2415_v37  ;;  %v751_v57 = vadd.f32 %v1899_v35, %v2417_v38  ;;  %v749_v59 = vadd.f32 %v2417_v38, %v595_v40 }
  0xef   : > { %2022 = vtanh.f32 %v718_v41  ;;  %v722_v63 = vadd.f32 %v1902_v45, %v2411_v32  ;;  %v738_v2 = vadd.f32 %v1902_v45, %v2415_v37  ;;  %v754_v5 = vadd.f32 %v1902_v45, %v2417_v38  ;;  %v2457_v13 = vpop.f32.mrf.mxu1 }
  0xf0   : > { %2024 = vtanh.f32 %v734_v42  ;;  %v704_v8 = vadd.f32 %v2409_v28, %v608_v50  ;;  %v720_v10 = vadd.f32 %v2411_v32, %v608_v50  ;;  %v736_v12 = vadd.f32 %v2415_v37, %v608_v50 }
  0xf1   : > { %2026 = vtanh.f32 %v750_v43  ;;  %v721_v16 = vadd.f32 %v2411_v32, %v2446_v3  ;;  %v752_v19 = vadd.f32 %v2417_v38, %v608_v50  ;;  %v707_v22 = vadd.f32 %v2438_v58, %v2409_v28  ;;  %v2470_v26 = vpop.f32.mrf.mxu1 }
  0xf2   : > { %2028 = vtanh.f32 %v701_v44  ;;  %v710_v25 = vadd.f32 %v2457_v13, %v2409_v28  ;;  %v726_v31 = vadd.f32 %v2457_v13, %v2411_v32  ;;  %v723_v36 = vadd.f32 %v2438_v58, %v2411_v32 }
  0xf3   : > { %2030 = vtanh.f32 %v717_v46  ;;  %v739_v40 = vadd.f32 %v2438_v58, %v2415_v37  ;;  %v708_v42 = vadd.f32 %v2409_v28, %v2470_v26  ;;  %v2484_v43 = vpop.f32.mrf.mxu1 }
  0xf4   : > { %2032 = vtanh.f32 %v732_v47  ;;  %v724_v47 = vadd.f32 %v2411_v32, %v2470_v26 }
  0xf5   : > { %2034 = vtanh.f32 %v748_v48 }
  0xf6   : > { %2036 = vtanh.f32 %v703_v49 }
  0xf7   : > { %2038 = vtanh.f32 %v733_v52  ;;  %v755_v52 = vadd.f32 %v2438_v58, %v2417_v38  ;;  %v727_v58 = vadd.f32 %v2484_v43, %v2411_v32 }
  0xf8   : > { %v2017_v53 = vpop.eup %2016  ;;  %2040 = vtanh.f32 %v719_v54  ;;  %v705_v54 = vadd.f32 %v2409_v28, %v2446_v3 }
  0xf9   : > { %v835_v56 = vmul.f32 %v2017_v53, %v2431_v51  ;;  %2042 = vtanh.f32 %v735_v55 }
  0xfa   : > { %v2019_v61 = vpop.eup %2018  ;;  %2044 = vtanh.f32 %v751_v57  ;;  %v627_v57 = vpop.f32.mrf.mxu1 }
  0xfb   : > { %v899_v60 = vsel %vm425_vm2, %v835_v56, 0.0  ;;  %v851_v0 = vmul.f32 %v2019_v61, %v2431_v51  ;;  %v2021_v4 = vpop.eup %2020  ;;  %2046 = vtanh.f32 %v749_v59  ;;  %v711_v56 = vadd.f32 %v2484_v43, %v2409_v28 }
  0xfc   : > { %900 = vadd.xlane.f32.xlu0 %v899_v60  ;;  %v2023_v7 = vpop.eup %2022  ;;  %2048 = vtanh.f32 %v706_v62  ;;  %v837_v29 = vmul.f32 %v2021_v4, %v2431_v51 }
  0xfd   : > { %v947_v6 = vsel %vm425_vm2, %v851_v0, 0.0  ;;  %v2451_v9 = vpop.eup %2024  ;;  %2050 = vtanh.f32 %v722_v63  ;;  %v853_v34 = vmul.f32 %v2023_v7, %v2431_v51  ;;  %v709_v7 = vadd.f32 %v2409_v28, %v627_v57 }
  0xfe   : > { %948 = vadd.xlane.f32.xlu1 %v947_v6  ;;  %v2454_v11 = vpop.eup %2026  ;;  %2052 = vtanh.f32 %v738_v2  ;;  %v905_v44 = vsel %vm425_vm2, %v837_v29, 0.0  ;;  %v743_v2 = vadd.f32 %v2484_v43, %v2415_v37 }
  0xff   : > { %v2029_v14 = vpop.eup %2028  ;;  %2054 = vtanh.f32 %v754_v5  ;;  %v953_v48 = vsel %vm425_vm2, %v853_v34, 0.0  ;;  %v737_v5 = vadd.f32 %v2415_v37, %v2446_v3 }
 0x100   : > { %v2031_v18 = vpop.eup %2030  ;;  %2056 = vtanh.f32 %v704_v8  ;;  %v836_v20 = vmul.f32 %v2029_v14, %v2431_v51  ;;  %v1910_v8 = vpop.f32.mrf.mxu1 }
 0x101   : > { %v2033_v21 = vpop.eup %2032  ;;  %2058 = vtanh.f32 %v720_v10  ;;  %v852_v23 = vmul.f32 %v2031_v18, %v2431_v51  ;;  %v714_v29 = vadd.f32 %v1910_v8, %v2409_v28 }
 0x102   : > { %v2466_v24 = vpop.eup %2034  ;;  %2060 = vtanh.f32 %v736_v12  ;;  %v902_v27 = vsel %vm425_vm2, %v836_v20, 0.0  ;;  %v867_v60 = vmul.f32 %v2033_v21, %v2431_v51  ;;  %v869_v12 = vmul.f32 %v2451_v9, %v2431_v51 }
 0x103   : > { %v2037_v30 = vpop.eup %2036  ;;  %2062 = vtanh.f32 %v721_v16  ;;  %903 = vadd.xlane.f32.xlu0 %v902_v27  ;;  %v950_v33 = vsel %vm425_vm2, %v852_v23, 0.0  ;;  %v725_v16 = vadd.f32 %v2411_v32, %v627_v57  ;;  %v741_v21 = vadd.f32 %v2415_v37, %v627_v57 }
 0x104   : > { %v2039_v35 = vpop.eup %2038  ;;  %2064 = vtanh.f32 %v752_v19  ;;  %951 = vadd.xlane.f32.xlu1 %v950_v33  ;;  %v838_v45 = vmul.f32 %v2037_v30, %v2431_v51  ;;  %v995_v10 = vsel %vm425_vm2, %v867_v60, 0.0  ;;  %v757_v9 = vadd.f32 %v2417_v38, %v627_v57  ;;  %v640_v30 = vpop.f32.mrf.mxu1 }
 0x105   : > { %v2041_v39 = vpop.eup %2040  ;;  %2066 = vtanh.f32 %v707_v22  ;;  %v868_v49 = vmul.f32 %v2039_v35, %v2431_v51  ;;  %v730_v35 = vadd.f32 %v1910_v8, %v2411_v32 }
 0x106   : > { %v2043_v41 = vpop.eup %2042  ;;  %2068 = vtanh.f32 %v710_v25  ;;  %v908_v59 = vsel %vm425_vm2, %v838_v45, 0.0  ;;  %v854_v63 = vmul.f32 %v2041_v39, %v2431_v51  ;;  %v2259_v25 = vmov 0  }
 0x107   : > { %v2488_v46 = vpop.eup %2044  ;;  %2070 = vtanh.f32 %v726_v31  ;;  %906 = vadd.xlane.f32.xlu0 %v905_v44  ;;  %v998_v62 = vsel %vm425_vm2, %v868_v49, 0.0  ;;  %v870_v19 = vmul.f32 %v2043_v41, %v2431_v51  ;;  %v1001_v31 = vsel %vm425_vm2, %v869_v12, 0.0 }
 0x108   : > { %v2494_v50 = vpop.eup %2046  ;;  %2072 = vtanh.f32 %v723_v36  ;;  %954 = vadd.xlane.f32.xlu1 %v953_v48  ;;  %v956_v18 = vsel %vm425_vm2, %v854_v63, 0.0  ;;  %1996 = vset.pattern.permute.xlu0 %v2259_v25  ;;  %v746_v41 = vadd.f32 %v1910_v8, %v2415_v37  ;;  %v762_v45 = vadd.f32 %v1910_v8, %v2417_v38 }
 0x109   : > { %v2049_v53 = vpop.eup %2048  ;;  %2074 = vtanh.f32 %v739_v40  ;;  %v1004_v36 = vsel %vm425_vm2, %v870_v19, 0.0  ;;  %v712_v49 = vadd.f32 %v2409_v28, %v640_v30  ;;  %v883_v19 = vmul.f32 %v2466_v24, %v2431_v51 }
 0x10a   : > { %v2051_v55 = vpop.eup %2050  ;;  %2076 = vtanh.f32 %v708_v42  ;;  %v841_v39 = vmul.f32 %v2049_v53, %v2431_v51 }
 0x10b   : > { %v2504_v61 = vpop.eup %2052  ;;  %2078 = vtanh.f32 %v724_v47  ;;  %909 = vadd.xlane.f32.xlu0 %v908_v59  ;;  %v857_v33 = vmul.f32 %v2051_v55, %v2431_v51 }
 0x10c   : > { %v2510_v0 = vpop.eup %2054  ;;  %2080 = vtanh.f32 %v755_v52  ;;  %999 = vadd.xlane.f32.xlu1 %v998_v62  ;;  %v1911_v52 = vpop.f32.mrf.mxu1  ;;  %v917_v57 = vsel %vm425_vm2, %v841_v39, 0.0  ;;  %v873_v59 = vmul.f32 %v2504_v61, %v2431_v51 }
 0x10d   : > { %v2514_v4 = vpop.eup %2056  ;;  %2082 = vtanh.f32 %v705_v54  ;;  %v965_v53 = vsel %vm425_vm2, %v857_v33, 0.0  ;;  %v884_v54 = vmul.f32 %v2494_v50, %v2431_v51  ;;  %v760_v50 = vadd.f32 %v2417_v38, %v640_v30 }
 0x10e   : > { %v2518_v6 = vpop.eup %2058  ;;  %2084 = vtanh.f32 %v711_v56  ;;  %v728_v56 = vadd.f32 %v2411_v32, %v640_v30  ;;  %v715_v61 = vadd.f32 %v1911_v52, %v2409_v28  ;;  %v885_v33 = vmul.f32 %v2454_v11, %v2431_v51 }
 0x10f   : > { %v2524_v14 = vpop.eup %2060  ;;  %2086 = vtanh.f32 %v727_v58  ;;  %996 = vadd.xlane.f32.xlu0 %v995_v10  ;;  %v744_v58 = vadd.f32 %v2415_v37, %v640_v30  ;;  %v1046_v8 = vsel %vm425_vm2, %v884_v54, 0.0  ;;  %v855_v10 = vmul.f32 %v2518_v6, %v2431_v51 }
 0x110   : > { %v2063_v20 = vpop.eup %2062  ;;  %2088 = vtanh.f32 %v743_v2  ;;  %957 = vadd.xlane.f32.xlu1 %v956_v18  ;;  %v1013_v18 = vsel %vm425_vm2, %v873_v59, 0.0  ;;  %v763_v6 = vadd.f32 %v1911_v52, %v2417_v38  ;;  %v839_v39 = vmul.f32 %v2514_v4, %v2431_v51 }
 0x111   : > { %v2530_v22 = vpop.eup %2064  ;;  %2090 = vtanh.f32 %v737_v5  ;;  %v2534_v23 = vmul.f32 %v2063_v20, %v2431_v51  ;;  %v959_v24 = vsel %vm425_vm2, %v855_v10, 0.0  ;;  %v886_v4 = vmul.f32 %v2488_v46, %v2431_v51 }
 0x112   : > { %v2536_v27 = vpop.eup %2066  ;;  %2092 = vtanh.f32 %v709_v7  ;;  %v643_v7 = vpop.f32.mrf.mxu1 }
 0x113   : > { %v2069_v34 = vpop.eup %2068  ;;  %2094 = vtanh.f32 %v725_v16  ;;  %1002 = vadd.xlane.f32.xlu0 %v1001_v31  ;;  %v731_v16 = vadd.f32 %v1911_v52, %v2411_v32 }
 0x114   : > { %v2071_v40 = vpop.eup %2070  ;;  %2096 = vtanh.f32 %v741_v21  ;;  %1005 = vadd.xlane.f32.xlu1 %v1004_v36  ;;  %v2546_v42 = vmul.f32 %v2069_v34, %v2431_v51  ;;  %v747_v21 = vadd.f32 %v1911_v52, %v2415_v37  ;;  %v729_v36 = vadd.f32 %v2411_v32, %v643_v7 }
 0x115   : > { %v2548_v44 = vpop.eup %2072  ;;  %2098 = vtanh.f32 %v757_v9  ;;  %v2552_v47 = vmul.f32 %v2071_v40, %v2431_v51 }
 0x116   : > { %v2554_v48 = vpop.eup %2074  ;;  %2100 = vtanh.f32 %v714_v29  ;;  %v713_v29 = vadd.f32 %v2409_v28, %v643_v7  ;;  %v1043_v28 = vsel %vm425_vm2, %v883_v19, 0.0  ;;  %v842_v19 = vmul.f32 %v2536_v27, %v2431_v51 }
 0x117   : > { %v2077_v55 = vpop.eup %2076  ;;  %2102 = vtanh.f32 %v730_v35  ;;  %966 = vadd.xlane.f32.xlu0 %v965_v53  ;;  %v1049_v53 = vsel %vm425_vm2, %v885_v33, 0.0 }
 0x118   : > { %v2079_v60 = vpop.eup %2078  ;;  %2104 = vtanh.f32 %v746_v41  ;;  %918 = vadd.xlane.f32.xlu1 %v917_v57  ;;  %v2566_v62 = vmul.f32 %v2077_v55, %v2431_v51  ;;  %v745_v41 = vadd.f32 %v2415_v37, %v643_v7  ;;  %v871_v57 = vmul.f32 %v2524_v14, %v2431_v51 }
 0x119   : > { %v2568_v63 = vpop.eup %2080  ;;  %2106 = vtanh.f32 %v762_v45  ;;  %v2572_v2 = vmul.f32 %v2079_v60, %v2431_v51  ;;  %v1052_v14 = vsel %vm425_vm2, %v886_v4, 0.0 }
 0x11a   : > { %v2574_v5 = vpop.eup %2082  ;;  %2108 = vtanh.f32 %v712_v49  ;;  %v761_v49 = vadd.f32 %v2417_v38, %v643_v7  ;;  %v753_v7 = vadd.f32 %v2417_v38, %v2446_v3 }
 0x11b   : > { %v2085_v12 = vpop.eup %2084  ;;  %2110 = vtanh.f32 %v728_v56  ;;  %1047 = vadd.xlane.f32.xlu0 %v1046_v8  ;;  %v911_v56 = vsel %vm425_vm2, %v839_v39, 0.0  ;;  %v887_v8 = vmul.f32 %v2530_v22, %v2431_v51 }
 0x11c   : > { %v2087_v20 = vpop.eup %2086  ;;  %2112 = vtanh.f32 %v744_v58  ;;  %1014 = vadd.xlane.f32.xlu1 %v1013_v18  ;;  %v2586_v9 = vmul.f32 %v2085_v12, %v2431_v51  ;;  %v1007_v18 = vsel %vm425_vm2, %v871_v57, 0.0  ;;  %v840_v57 = vmul.f32 %v2574_v5, %v2431_v51 }
 0x11d   : > { %v2089_v25 = vpop.eup %2088  ;;  %2114 = vtanh.f32 %v760_v50  ;;  %v2591_v30 = vmul.f32 %v2087_v20, %v2431_v51 }
 0x11e   : > { %v2593_v31 = vpop.eup %2090  ;;  %2116 = vtanh.f32 %v715_v61  ;;  %v2599_v34 = vmul.f32 %v2089_v25, %v2431_v51 }
 0x11f   : > { %v2093_v35 = vpop.eup %2092  ;;  %2118 = vtanh.f32 %v731_v16  ;;  %960 = vadd.xlane.f32.xlu0 %v959_v24  ;;  %v742_v16 = vadd.f32 %v2457_v13, %v2415_v37  ;;  %v889_v24 = vmul.f32 %v2510_v0, %v2431_v51 }
 0x120   : > { %v2095_v40 = vpop.eup %2094  ;;  %2120 = vtanh.f32 %v747_v21  ;;  %1044 = vadd.xlane.f32.xlu1 %v1043_v28  ;;  %v2607_v11 = vmul.f32 %v2093_v35, %v2431_v51  ;;  %v920_v35 = vsel %vm425_vm2, %v842_v19, 0.0 }
 0x121   : > { %v2097_v45 = vpop.eup %2096  ;;  %2122 = vtanh.f32 %v763_v6  ;;  %v2611_v32 = vmul.f32 %v2095_v40, %v2431_v51 }
 0x122   : > { %v2099_v52 = vpop.eup %2098  ;;  %2124 = vtanh.f32 %v713_v29  ;;  %v2617_v54 = vmul.f32 %v2097_v45, %v2431_v51  ;;  %v1055_v29 = vsel %vm425_vm2, %v887_v8, 0.0  ;;  %v914_v8 = vsel %vm425_vm2, %v840_v57, 0.0 }
 0x123   : > { %v2101_v55 = vpop.eup %2100  ;;  %2126 = vtanh.f32 %v729_v36  ;;  %1050 = vadd.xlane.f32.xlu0 %v1049_v53  ;;  %v2623_v59 = vmul.f32 %v2099_v52, %v2431_v51  ;;  %v874_v36 = vmul.f32 %v2554_v48, %v2431_v51  ;;  %v1061_v52 = vsel %vm425_vm2, %v889_v24, 0.0 }
 0x124   : > { %v2103_v60 = vpop.eup %2102  ;;  %2128 = vtanh.f32 %v745_v41  ;;  %912 = vadd.xlane.f32.xlu1 %v911_v56  ;;  %v2626_v58 = vmul.f32 %v2101_v55, %v2431_v51  ;;  %v858_v48 = vmul.f32 %v2548_v44, %v2431_v51  ;;  %v740_v55 = vadd.f32 %v2415_v37, %v2470_v26 }
 0x125   : > { %v2105_v46 = vpop.eup %2104  ;;  %2130 = vtanh.f32 %v761_v49  ;;  %v2629_v50 = vmul.f32 %v2103_v60, %v2431_v51  ;;  %v758_v49 = vadd.f32 %v2457_v13, %v2417_v38  ;;  %v1016_v56 = vsel %vm425_vm2, %v874_v36, 0.0 }
 0x126   : > { %v2107_v61 = vpop.eup %2106  ;;  %v2637_v10 = vmul.f32 %v2105_v46, %v2431_v51  ;;  %2132 = vtanh.f32 %v753_v7  ;;  %v968_v37 = vsel %vm425_vm2, %v858_v48, 0.0  ;;  %v759_v24 = vadd.f32 %v2484_v43, %v2417_v38 }
 0x127   : > { %v2109_v12 = vpop.eup %2108  ;;  %1053 = vadd.xlane.f32.xlu0 %v1052_v14  ;;  %v2645_v3 = vmul.f32 %v2107_v61, %v2431_v51  ;;  %2134 = vtanh.f32 %v742_v16  ;;  %v890_v14 = vmul.f32 %v2568_v63, %v2431_v51  ;;  %v932_v48 = vsel %vm425_vm2, %v2586_v9, 0.0 }
 0x128   : > { %v2111_v20 = vpop.eup %2110  ;;  %1008 = vadd.xlane.f32.xlu1 %v1007_v18  ;;  %v2648_v22 = vmul.f32 %v2109_v12, %v2431_v51  ;;  %2136 = vtanh.f32 %v758_v49  ;;  %v872_v12 = vmul.f32 %v2593_v31, %v2431_v51  ;;  %v756_v18 = vadd.f32 %v2417_v38, %v2470_v26 }
 0x129   : > { %v2113_v21 = vpop.eup %2112  ;;  %v2651_v25 = vmul.f32 %v2111_v20, %v2431_v51  ;;  %2138 = vtanh.f32 %v740_v55  ;;  %v1064_v19 = vsel %vm425_vm2, %v890_v14, 0.0  ;;  %v1028_v55 = vsel %vm425_vm2, %v2599_v34, 0.0 }
 0x12a   : > { %v2115_v6 = vpop.eup %2114  ;;  %v2657_v27 = vmul.f32 %v2113_v21, %v2431_v51  ;;  %v1010_v20 = vsel %vm425_vm2, %v872_v12, 0.0  ;;  %2140 = vtanh.f32 %v756_v18  ;;  %v926_v57 = vsel %vm425_vm2, %v2607_v11, 0.0 }
 0x12b   : > { %v2117_v33 = vpop.eup %2116  ;;  %1056 = vadd.xlane.f32.xlu0 %v1055_v29  ;;  %v2663_v28 = vmul.f32 %v2115_v6, %v2431_v51  ;;  %v962_v6 = vsel %vm425_vm2, %v2534_v23, 0.0  ;;  %v929_v29 = vsel %vm425_vm2, %v2546_v42, 0.0  ;;  %2142 = vtanh.f32 %v759_v24 }
 0x12c   : > { %v2119_v39 = vpop.eup %2118  ;;  %921 = vadd.xlane.f32.xlu1 %v920_v35  ;;  %v2666_v40 = vmul.f32 %v2117_v33, %v2431_v51  ;;  %v977_v23 = vsel %vm425_vm2, %v2552_v47, 0.0  ;;  %v974_v34 = vsel %vm425_vm2, %v2611_v32, 0.0  ;;  %v1037_v11 = vsel %vm425_vm2, %v2637_v10, 0.0 }
 0x12d   : > { %v2121_v0 = vpop.eup %2120  ;;  %v2669_v41 = vmul.f32 %v2119_v39, %v2431_v51  ;;  %v935_v32 = vsel %vm425_vm2, %v2648_v22, 0.0  ;;  %v983_v10 = vsel %vm425_vm2, %v2651_v25, 0.0  ;;  %v1079_v22 = vsel %vm425_vm2, %v2663_v28, 0.0 }
 0x12e   : > { %v2123_v45 = vpop.eup %2122  ;;  %v2677_v53 = vmul.f32 %v2121_v0, %v2431_v51  ;;  %v923_v0 = vsel %vm425_vm2, %v2566_v62, 0.0 }
 0x12f   : > { %v2125_v4 = vpop.eup %2124  ;;  %1062 = vadd.xlane.f32.xlu0 %v1061_v52  ;;  %v2685_v13 = vmul.f32 %v2123_v45, %v2431_v51  ;;  %v971_v52 = vsel %vm425_vm2, %v2572_v2, 0.0 }
 0x130   : > { %v2127_v60 = vpop.eup %2126  ;;  %1017 = vadd.xlane.f32.xlu1 %v1016_v56  ;;  %v2688_v44 = vmul.f32 %v2125_v4, %v2431_v51  ;;  %v980_v56 = vsel %vm425_vm2, %v2591_v30, 0.0  ;;  %v941_v30 = vsel %vm425_vm2, %v2626_v58, 0.0  ;;  %v1085_v58 = vsel %vm425_vm2, %v2645_v3, 0.0 }
 0x131   : > { %v2129_v46 = vpop.eup %2128  ;;  %v2691_v61 = vmul.f32 %v2127_v60, %v2431_v51  ;;  %v1022_v60 = vsel %vm425_vm2, %v2617_v54, 0.0  ;;  %v989_v54 = vsel %vm425_vm2, %v2629_v50, 0.0  ;;  %v944_v50 = vsel %vm425_vm2, %v2666_v40, 0.0 }
 0x132   : > { %v2131_v7 = vpop.eup %2130  ;;  %v2697_v5 = vmul.f32 %v2129_v46, %v2431_v51  ;;  %v1040_v3 = vsel %vm425_vm2, %v2677_v53, 0.0  ;;  %v938_v25 = vsel %vm425_vm2, %v2688_v44, 0.0  ;;  %v2780_v46 = vand.u32 127, %v659_v15 }
 0x133   : > { %969 = vadd.xlane.f32.xlu0 %v968_v37  ;;  %v2703_v16 = vmul.f32 %v2131_v7, %v2431_v51  ;;  %v2133_v63 = vpop.eup %2132  ;;  %v986_v40 = vsel %vm425_vm2, %v2691_v61, 0.0 }
 0x134   : > { %915 = vadd.xlane.f32.xlu1 %v914_v8  ;;  %v2135_v21 = vpop.eup %2134  ;;  %v888_v31 = vmul.f32 %v2133_v63, %v2431_v51  ;;  %v1034_v28 = vsel %vm425_vm2, %v2697_v5, 0.0  ;;  %v1166_v44 = vadd.s32 4294967288, %v2780_v46  ;;  %v1164_v37 = vsub.s32 %v2780_v46, %v2405_v17 }
 0x135   : > { %v877_v26 = vmul.f32 %v2135_v21, %v2431_v51  ;;  %v2137_v35 = vpop.eup %2136  ;;  %v1082_v53 = vsel %vm425_vm2, %v2703_v16, 0.0  ;;  %v1173_v5 = vadd.s32 4294967280, %v2780_v46  ;;  %v1180_v18 = vadd.s32 4294967272, %v2780_v46 }
 0x136   : > { %v1058_v33 = vsel %vm425_vm2, %v888_v31, 0.0  ;;  %v2139_v39 = vpop.eup %2138  ;;  %v893_v42 = vmul.f32 %v2137_v35, %v2431_v51  ;;  %v1169_v14 = vsub.s32 %v1166_v44, %v2405_v17 }
 0x137   : > { %1065 = vadd.xlane.f32.xlu0 %v1064_v19  ;;  %v1025_v36 = vsel %vm425_vm2, %v877_v26, 0.0  ;;  %v875_v38 = vmul.f32 %v2139_v39, %v2431_v51  ;;  %v2141_v45 = vpop.eup %2140  ;;  %v1176_v16 = vsub.s32 %v1173_v5, %v2405_v17  ;;  %v1183_v24 = vsub.s32 %v1180_v18, %v2405_v17 }
 0x138   : > { %1011 = vadd.xlane.f32.xlu1 %v1010_v20  ;;  %v1073_v43 = vsel %vm425_vm2, %v893_v42, 0.0  ;;  %v891_v47 = vmul.f32 %v2141_v45, %v2431_v51  ;;  %v2143_v4 = vpop.eup %2142  ;;  %v1093_v20 = vld [vmem:[%s406_s19] sm:$0xf]  ;;  %s2152_s19 = sshll.u32 %s2260_s16, 4  ;;  %s2153_s19 = int_to_ptr.vmem [resolvable:$false] %s2152_s19 }
 0x139   : > { %v1019_v49 = vsel %vm425_vm2, %v875_v38, 0.0  ;;  %v894_v2 = vmul.f32 %v2143_v4, %v2431_v51  ;;  %v1070_v51 = vsel %vm425_vm2, %v2623_v59, 0.0  ;;  %v1031_v59 = vsel %vm425_vm2, %v2657_v27, 0.0  ;;  %s2154_s20 = scalar_lea.vmem %s2153_s19, 128  ;;  %p2155_p1 = scmp.lt.s32.totalorder %s1673_s11, %s2153_s19 }
 0x13a   : > { %v1067_v62 = vsel %vm425_vm2, %v891_v47, 0.0  ;;  %v992_v27 = vsel %vm425_vm2, %v2669_v41, 0.0  ;;  %v1088_v41 = vsel %vm425_vm2, %v2685_v13, 0.0  ;;  %p2156_p2 = scmp.lt.s32.totalorder %s2154_s20, %s2148_s14 }
 0x13b   : > { %963 = vadd.xlane.f32.xlu0 %v962_v6  ;;  %v1076_v9 = vsel %vm425_vm2, %v894_v2, 0.0  ;;  %vm1508_vm2 = vcmask 1041409  }
 0x13c   : > { %930 = vadd.xlane.f32.xlu1 %v929_v29  ;;  %p2157_p3 = por %p2156_p2, %p2155_p1 }
 0x13e   : > { %p2158_p5 = pnand %p2157_p3, %p2151_p0 }
 0x13f   : > { %1059 = vadd.xlane.f32.xlu0 %v1058_v33 }
 0x140   : > { %1026 = vadd.xlane.f32.xlu1 %v1025_v36 }
 0x143   : > { %978 = vadd.xlane.f32.xlu0 %v977_v23 }
 0x144   : > { %924 = vadd.xlane.f32.xlu1 %v923_v0 }
 0x147   : > { %1074 = vadd.xlane.f32.xlu0 %v1073_v43 }
 0x148   : > { %1020 = vadd.xlane.f32.xlu1 %v1019_v49 }
 0x14b   : > { %972 = vadd.xlane.f32.xlu0 %v971_v52 }
 0x14c   : > { %933 = vadd.xlane.f32.xlu1 %v932_v48 }
 0x14f   : > { %1068 = vadd.xlane.f32.xlu0 %v1067_v62 }
 0x150   : > { %1029 = vadd.xlane.f32.xlu1 %v1028_v55 }
 0x153   : > { %981 = vadd.xlane.f32.xlu0 %v980_v56 }
 0x154   : > { %927 = vadd.xlane.f32.xlu1 %v926_v57 }
 0x157   : > { %1077 = vadd.xlane.f32.xlu0 %v1076_v9 }
 0x158   : > { %1023 = vadd.xlane.f32.xlu1 %v1022_v60 }
 0x15b   : > { %975 = vadd.xlane.f32.xlu0 %v974_v34  ;;  %v1187_v34 = vadd.s32 4294967264, %v2780_v46 }
 0x15c   : > { %942 = vadd.xlane.f32.xlu1 %v941_v30 }
 0x15f   : > { %1071 = vadd.xlane.f32.xlu0 %v1070_v51 }
 0x160   : > { %1038 = vadd.xlane.f32.xlu1 %v1037_v11  ;;  %v1190_v11 = vsub.s32 %v1187_v34, %v2405_v17 }
 0x163   : > { %990 = vadd.xlane.f32.xlu0 %v989_v54 }
 0x164   : > { %936 = vadd.xlane.f32.xlu1 %v935_v32 }
 0x167   : > { %1086 = vadd.xlane.f32.xlu0 %v1085_v58 }
 0x168   : > { %1032 = vadd.xlane.f32.xlu1 %v1031_v59 }
 0x16b   : > { %984 = vadd.xlane.f32.xlu0 %v983_v10 }
 0x16c   : > { %945 = vadd.xlane.f32.xlu1 %v944_v50 }
 0x16f   : > { %1080 = vadd.xlane.f32.xlu0 %v1079_v22 }
 0x170   : > { %1041 = vadd.xlane.f32.xlu1 %v1040_v3 }
 0x173   : > { %993 = vadd.xlane.f32.xlu0 %v992_v27 }
 0x174   : > { %939 = vadd.xlane.f32.xlu1 %v938_v25 }
 0x177   : > { %987 = vadd.xlane.f32.xlu0 %v986_v40 }
 0x178   : > { %1035 = vadd.xlane.f32.xlu1 %v1034_v28 }
 0x17b   : > { %1083 = vadd.xlane.f32.xlu0 %v1082_v53 }
 0x17c   : > { %1089 = vadd.xlane.f32.xlu1 %v1088_v41 }
 0x185   : > { %v901_v7 = vpop.xlane.xlu0 %900 }
 0x186   : > { %v1165_v15 = vrot.slane %v901_v7, %v1164_v37 }
 0x187   : > { %v949_v61 = vpop.xlane.xlu1 %948 }
 0x188   : > { %v1274_v19 = vrot.slane %v949_v61, %v1164_v37 }
 0x18c   : > { %v904_v13 = vpop.xlane.xlu0 %903 }
 0x18d   : > { %v1170_v8 = vrot.slane %v904_v13, %v1169_v14  ;;  %v952_v12 = vpop.xlane.xlu1 %951 }
 0x18e   : > { %v1278_v63 = vrot.slane %v952_v12, %v1169_v14 }
 0x18f   : > { %v1172_v21 = vsel %vm1171_vm3, %v1170_v8, %v1165_v15  ;;  %v1194_v8 = vadd.s32 4294967256, %v2780_v46 }
 0x190   : > { %v1279_v6 = vsel %vm1171_vm3, %v1278_v63, %v1274_v19  ;;  %v907_v31 = vpop.xlane.xlu0 %906  ;;  %v1201_v19 = vadd.s32 4294967248, %v2780_v46 }
 0x191   : > { %v1177_v29 = vrot.slane %v907_v31, %v1176_v16  ;;  %1095 = vperm.xlu0 %1996, %v1093_v20   ;;  %v955_v26 = vpop.xlane.xlu1 %954  ;;  %v1197_v20 = vsub.s32 %v1194_v8, %v2405_v17  ;;  %v1236_v8 = vadd.s32 4294967208, %v2780_v46 }
 0x192   : > { %v1283_v33 = vrot.slane %v955_v26, %v1176_v16  ;;  %v1204_v31 = vsub.s32 %v1201_v19, %v2405_v17 }
 0x193   : > { %v1179_v35 = vsel %vm1178_vm4, %v1177_v29, %v1172_v21 }
 0x194   : > { %v1284_v36 = vsel %vm1178_vm4, %v1283_v33, %v1279_v6  ;;  %v910_v39 = vpop.xlane.xlu0 %909 }
 0x195   : > { %v1184_v23 = vrot.slane %v910_v39, %v1183_v24  ;;  %v1000_v42 = vpop.xlane.xlu1 %999 }
 0x196   : > { %v1357_v43 = vrot.slane %v1000_v42, %v1169_v14 }
 0x197   : > { %v1186_v0 = vsel %vm1185_vm5, %v1184_v23, %v1179_v35 }
 0x198   : > { %v997_v38 = vpop.xlane.xlu0 %996 }
 0x199   : > { %v1353_v45 = vrot.slane %v997_v38, %v1164_v37  ;;  %v958_v49 = vpop.xlane.xlu1 %957 }
 0x19a   : > { %v1288_v52 = vrot.slane %v958_v49, %v1183_v24 }
 0x19b   : > { %v1358_v47 = vsel %vm1171_vm3, %v1357_v43, %v1353_v45 }
 0x19c   : > { %v1289_v48 = vsel %vm1185_vm5, %v1288_v52, %v1284_v36  ;;  %v1003_v62 = vpop.xlane.xlu0 %1002 }
 0x19d   : > { %v1362_v4 = vrot.slane %v1003_v62, %v1176_v16  ;;  %v1006_v55 = vpop.xlane.xlu1 %1005 }
 0x19e   : > { %v1367_v56 = vrot.slane %v1006_v55, %v1183_v24 }
 0x19f   : > { %v1363_v2 = vsel %vm1178_vm4, %v1362_v4, %v1358_v47 }
 0x1a0   : > { %v1368_v57 = vsel %vm1185_vm5, %v1367_v56, %v1363_v2  ;;  %v2803_v9 = vpop.xlane.xlu0 %966 }
 0x1a1   : > { %v919_v60 = vpop.xlane.xlu1 %918  ;;  %v1303_v62 = vrot.slane %v2803_v9, %v1204_v31 }
 0x1a4   : > { %v1048_v30 = vpop.xlane.xlu0 %1047 }
 0x1a5   : > { %v1015_v51 = vpop.xlane.xlu1 %1014  ;;  %v1436_v59 = vrot.slane %v1048_v30, %v1169_v14 }
 0x1a6   : > { %v1382_v38 = vrot.slane %v1015_v51, %v1204_v31 }
 0x1a8   : > { %v961_v54 = vpop.xlane.xlu0 %960 }
 0x1a9   : > { %v1293_v32 = vrot.slane %v961_v54, %v1190_v11  ;;  %v1045_v58 = vpop.xlane.xlu1 %1044 }
 0x1aa   : > { %v1432_v10 = vrot.slane %v1045_v58, %v1164_v37 }
 0x1ab   : > { %v1294_v50 = vsel %vm1192_vm6, %v1293_v32, %v1289_v48 }
 0x1ac   : > { %v1437_v22 = vsel %vm1171_vm3, %v1436_v59, %v1432_v10  ;;  %v1051_v3 = vpop.xlane.xlu0 %1050  ;;  %vm1510_vm3 = vcmask 1042434  }
 0x1ad   : > { %v1441_v27 = vrot.slane %v1051_v3, %v1176_v16  ;;  %v913_v25 = vpop.xlane.xlu1 %912  ;;  %v1208_v16 = vadd.s32 4294967240, %v2780_v46 }
 0x1ae   : > { %v1191_v40 = vrot.slane %v913_v25, %v1190_v11 }
 0x1af   : > { %v1442_v28 = vsel %vm1178_vm4, %v1441_v27, %v1437_v22  ;;  %v2819_v21 = vsub.s32 %v1208_v16, %v2405_v17  ;;  %v1257_v16 = vadd.s32 4294967184, %v2780_v46  ;;  %vm1512_vm4 = vcmask 1043459  }
 0x1b0   : > { %v1193_v53 = vsel %vm1192_vm6, %v1191_v40, %v1186_v0  ;;  %v1054_v41 = vpop.xlane.xlu0 %1053 }
 0x1b1   : > { %v1446_v44 = vrot.slane %v1054_v41, %v1183_v24  ;;  %v1009_v7 = vpop.xlane.xlu1 %1008  ;;  %v1205_v24 = vrot.slane %v919_v60, %v1204_v31 }
 0x1b2   : > { %v1372_v61 = vrot.slane %v1009_v7, %v1190_v11 }
 0x1b3   : > { %v1447_v5 = vsel %vm1185_vm5, %v1446_v44, %v1442_v28  ;;  %vm1516_vm5 = vcmask 1043456  }
 0x1b4   : > { %v1373_v37 = vsel %vm1192_vm6, %v1372_v61, %v1368_v57  ;;  %v1057_v14 = vpop.xlane.xlu0 %1056  ;;  %v1215_v61 = vadd.s32 4294967232, %v2780_v46 }
 0x1b5   : > { %v1451_v13 = vrot.slane %v1057_v14, %v1190_v11  ;;  %v922_v15 = vpop.xlane.xlu1 %921 }
 0x1b6   : > { %v1212_v33 = vrot.slane %v922_v15, %v2819_v21  ;;  %v1218_v15 = vsub.s32 %v1215_v61, %v2405_v17 }
 0x1b7   : > { %v1452_v12 = vsel %vm1192_vm6, %v1451_v13, %v1447_v5  ;;  %v1222_v5 = vadd.s32 4294967224, %v2780_v46  ;;  %v1229_v13 = vadd.s32 4294967216, %v2780_v46 }
 0x1b8   : > { %v1063_v18 = vpop.xlane.xlu0 %1062 }
 0x1b9   : > { %v1018_v63 = vpop.xlane.xlu1 %1017  ;;  %v1461_v51 = vrot.slane %v1063_v18, %v1204_v31  ;;  %v2883_v31 = vsub.s32 %v1236_v8, %v2405_v17 }
 0x1ba   : > { %v1387_v43 = vrot.slane %v1018_v63, %v2819_v21  ;;  %v1232_v63 = vsub.s32 %v1229_v13, %v2405_v17 }
 0x1bc   : > { %v970_v6 = vpop.xlane.xlu0 %969 }
 0x1bd   : > { %v916_v29 = vpop.xlane.xlu1 %915  ;;  %v1308_v55 = vrot.slane %v970_v6, %v2819_v21 }
 0x1be   : > { %v1198_v26 = vrot.slane %v916_v29, %v1197_v20  ;;  %v1264_v29 = vadd.s32 4294967176, %v2780_v46 }
 0x1c0   : > { %v1200_v35 = vsel %vm1199_vm7, %v1198_v26, %v1193_v53  ;;  %v2824_v36 = vpop.xlane.xlu0 %1065 }
 0x1c1   : > { %v1207_v39 = vsel %vm1206_vm8, %v1205_v24, %v1200_v35  ;;  %v1012_v23 = vpop.xlane.xlu1 %1011  ;;  %v2887_v24 = vsub.s32 %v1257_v16, %v2405_v17  ;;  %v1250_v35 = vadd.s32 4294967192, %v2780_v46 }
 0x1c2   : > { %v1377_v42 = vrot.slane %v1012_v23, %v1197_v20  ;;  %v2828_v0 = vsel %vm1213_vm9, %v1212_v33, %v1207_v39 }
 0x1c4   : > { %v1378_v45 = vsel %vm1199_vm7, %v1377_v42, %v1373_v37  ;;  %v964_v49 = vpop.xlane.xlu0 %963 }
 0x1c5   : > { %v1383_v52 = vsel %vm1206_vm8, %v1382_v38, %v1378_v45  ;;  %v1298_v47 = vrot.slane %v964_v49, %v1197_v20  ;;  %v2833_v48 = vpop.xlane.xlu1 %930 }
 0x1c6   : > { %v2837_v4 = vsel %vm1213_vm9, %v1387_v43, %v1383_v52  ;;  %v1466_v52 = vrot.slane %v2824_v36, %v2819_v21 }
 0x1c7   : > { %v1299_v56 = vsel %vm1199_vm7, %v1298_v47, %v1294_v50 }
 0x1c8   : > { %v1304_v2 = vsel %vm1206_vm8, %v1303_v62, %v1299_v56  ;;  %v1060_v57 = vpop.xlane.xlu0 %1059 }
 0x1c9   : > { %v1456_v60 = vrot.slane %v1060_v57, %v1197_v20  ;;  %v2842_v34 = vpop.xlane.xlu1 %1026  ;;  %v2845_v30 = vsel %vm1213_vm9, %v1308_v55, %v1304_v2  ;;  %v1243_v20 = vadd.s32 4294967200, %v2780_v46  ;;  %v2902_v55 = vsub.s32 %v1264_v29, %v2405_v17 }
 0x1ca   : > { %v2908_v57 = vsub.s32 %v1250_v35, %v2405_v17 }
 0x1cb   : > { %v1457_v11 = vsel %vm1199_vm7, %v1456_v60, %v1452_v12  ;;  %v1225_v12 = vsub.s32 %v1222_v5, %v2405_v17  ;;  %v2895_v49 = vsub.s32 %v1243_v20, %v2405_v17  ;;  %v1233_v60 = vrot.slane %v2833_v48, %v1232_v63 }
 0x1cc   : > { %v1462_v9 = vsel %vm1206_vm8, %v1461_v51, %v1457_v11  ;;  %v2849_v54 = vpop.xlane.xlu0 %978  ;;  %v1402_v11 = vrot.slane %v2842_v34, %v1232_v63 }
 0x1cd   : > { %v925_v32 = vpop.xlane.xlu1 %924 }
 0x1ce   : > { %v1219_v6 = vrot.slane %v925_v32, %v1218_v15 }
 0x1d0   : > { %v2851_v58 = vpop.xlane.xlu0 %1074  ;;  %v1221_v47 = vsel %vm1220_vm10, %v1219_v6, %v2828_v0  ;;  %v1467_v0 = vsel %vm1213_vm9, %v1466_v52, %v1462_v9 }
 0x1d1   : > { %v1021_v59 = vpop.xlane.xlu1 %1020  ;;  %v1481_v9 = vrot.slane %v2851_v58, %v1232_v63 }
 0x1d2   : > { %v1392_v39 = vrot.slane %v1021_v59, %v1218_v15 }
 0x1d4   : > { %v973_v10 = vpop.xlane.xlu0 %972  ;;  %v1393_v21 = vsel %vm1220_vm10, %v1392_v39, %v2837_v4 }
 0x1d5   : > { %v2853_v50 = vpop.xlane.xlu1 %933  ;;  %v1313_v23 = vrot.slane %v973_v10, %v1218_v15  ;;  %v1323_v10 = vrot.slane %v2849_v54, %v1232_v63 }
 0x1d6   : > { %v1240_v34 = vrot.slane %v2853_v50, %v2883_v31 }
 0x1d7   : > { %v1314_v36 = vsel %vm1220_vm10, %v1313_v23, %v2845_v30 }
 0x1d8   : > { %v1069_v22 = vpop.xlane.xlu0 %1068 }
 0x1d9   : > { %v2855_v3 = vpop.xlane.xlu1 %1029  ;;  %v1471_v38 = vrot.slane %v1069_v22, %v1218_v15 }
 0x1db   : > { %v1472_v32 = vsel %vm1220_vm10, %v1471_v38, %v1467_v0 }
 0x1dc   : > { %v2857_v27 = vpop.xlane.xlu0 %981 }
 0x1dd   : > { %v928_v25 = vpop.xlane.xlu1 %927  ;;  %v1328_v54 = vrot.slane %v2857_v27, %v2883_v31 }
 0x1de   : > { %v1226_v26 = vrot.slane %v928_v25, %v1225_v12  ;;  %v1407_v25 = vrot.slane %v2855_v3, %v2883_v31 }
 0x1e0   : > { %v2859_v40 = vpop.xlane.xlu0 %1077  ;;  %v1228_v56 = vsel %vm1227_vm11, %v1226_v26, %v1221_v47 }
 0x1e1   : > { %v1024_v28 = vpop.xlane.xlu1 %1023  ;;  %v1235_v48 = vsel %vm1234_vm12, %v1233_v60, %v1228_v56  ;;  %v1486_v3 = vrot.slane %v2859_v40, %v2883_v31 }
 0x1e2   : > { %v1397_v43 = vrot.slane %v1024_v28, %v1225_v12  ;;  %v1242_v58 = vsel %vm1241_vm13, %v1240_v34, %v1235_v48  ;;  %v2012_v34 = vld [vmem:[%s2395_s24 + $0x18] sm:$0xff]  }
 0x1e4   : > { %v976_v53 = vpop.xlane.xlu0 %975  ;;  %v1398_v17 = vsel %vm1227_vm11, %v1397_v43, %v1393_v21 }
 0x1e5   : > { %v2861_v41 = vpop.xlane.xlu1 %942  ;;  %v1318_v45 = vrot.slane %v976_v53, %v1225_v12  ;;  %v1403_v28 = vsel %vm1234_vm12, %v1402_v11, %v1398_v17  ;;  %v2009_v17 = vld [vmem:[%s2395_s24 + $0x30] sm:$0xff]  }
 0x1e6   : > { %v1261_v13 = vrot.slane %v2861_v41, %v2887_v24  ;;  %v1408_v15 = vsel %vm1241_vm13, %v1407_v25, %v1403_v28  ;;  %v2014_v25 = vld [vmem:[%s2395_s24 + $0x8] sm:$0xff]  }
 0x1e7   : > { %v1319_v59 = vsel %vm1227_vm11, %v1318_v45, %v1314_v36 }
 0x1e8   : > { %v1072_v44 = vpop.xlane.xlu0 %1071  ;;  %v1324_v53 = vsel %vm1234_vm12, %v1323_v10, %v1319_v59 }
 0x1e9   : > { %v2863_v7 = vpop.xlane.xlu1 %1038  ;;  %v1476_v62 = vrot.slane %v1072_v44, %v1225_v12  ;;  %v1329_v8 = vsel %vm1241_vm13, %v1328_v54, %v1324_v53  ;;  %v2015_v54 = vld [vmem:[%s2395_s24] sm:$0xff]  }
 0x1ea   : > { %v1422_v63 = vrot.slane %v2863_v7, %v2887_v24 }
 0x1eb   : > { %v1477_v4 = vsel %vm1227_vm11, %v1476_v62, %v1472_v32  ;;  %v2008_v32 = vld [vmem:[%s2395_s24 + $0x38] sm:$0xff]  }
 0x1ec   : > { %v2867_v37 = vpop.xlane.xlu0 %990  ;;  %v1482_v61 = vsel %vm1234_vm12, %v1481_v9, %v1477_v4  ;;  %1913 = vmatpush3.bf16.msra.mxu1 %v2008_v32  ;;  %v2011_v9 = vld [vmem:[%s2395_s24 + $0x20] sm:$0xff]  }
 0x1ed   : > { %v2869_v14 = vpop.xlane.xlu1 %936  ;;  %v1343_v40 = vrot.slane %v2867_v37, %v2887_v24  ;;  %v1487_v20 = vsel %vm1241_vm13, %v1486_v3, %v1482_v61  ;;  %1914 = vmatprep.subr.bf16.mxu1 %v2256_v1 }
 0x1ee   : > { %v1247_v30 = vrot.slane %v2869_v14, %v2895_v49 }
 0x1f0   : > { %v2876_v18 = vpop.xlane.xlu0 %1086  ;;  %v1249_v14 = vsel %vm1248_vm14, %v1247_v30, %v1242_v58  ;;  %1915 = vmatpush3.bf16.msra.mxu1 %v2009_v17  ;;  %v2010_v30 = vld [vmem:[%s2395_s24 + $0x28] sm:$0xff]  }
 0x1f1   : > { %v2878_v19 = vpop.xlane.xlu1 %1032  ;;  %v1501_v39 = vrot.slane %v2876_v18, %v2887_v24  ;;  %1916 = vmatprep.subr.bf16.mxu1 %v2256_v1 }
 0x1f2   : > { %v1412_v27 = vrot.slane %v2878_v19, %v2895_v49 }
 0x1f4   : > { %v2889_v33 = vpop.xlane.xlu0 %984  ;;  %1917 = vmatpush3.bf16.msra.mxu1 %v2010_v30 }
 0x1f5   : > { %v2892_v42 = vpop.xlane.xlu1 %945  ;;  %v1333_v50 = vrot.slane %v2889_v33, %v2895_v49  ;;  %v1413_v33 = vsel %vm1248_vm14, %v1412_v27, %v1408_v15  ;;  %1918 = vmatprep.subr.bf16.mxu1 %v2256_v1 }
 0x1f6   : > { %v1268_v7 = vrot.slane %v2892_v42, %v2902_v55 }
 0x1f7   : > { %v1334_v41 = vsel %vm1248_vm14, %v1333_v50, %v1329_v8 }
 0x1f8   : > { %v2905_v2 = vpop.xlane.xlu0 %1080  ;;  %1919 = vmatpush3.bf16.msra.mxu1 %v2011_v9 }
 0x1f9   : > { %v1042_v51 = vpop.xlane.xlu1 %1041  ;;  %v1491_v31 = vrot.slane %v2905_v2, %v2895_v49  ;;  %1920 = vmatprep.subr.bf16.mxu1 %v2256_v1 }
 0x1fa   : > { %v1427_v23 = vrot.slane %v1042_v51, %v2902_v55 }
 0x1fb   : > { %v1492_v56 = vsel %vm1248_vm14, %v1491_v31, %v1487_v20 }
 0x1fc   : > { %v994_v22 = vpop.xlane.xlu0 %993  ;;  %1921 = vmatpush3.bf16.msra.mxu1 %v2012_v34 }
 0x1fd   : > { %v940_v44 = vpop.xlane.xlu1 %939  ;;  %v1348_v37 = vrot.slane %v994_v22, %v2902_v55  ;;  %v2013_v22 = vld [vmem:[%s2395_s24 + $0x10] sm:$0xff]   ;;  %1922 = vmatprep.subr.bf16.mxu1 %v2256_v1 }
 0x1fe   : > { %v1254_v5 = vrot.slane %v940_v44, %v2908_v57 }
 0x200   : > { %v1256_v12 = vsel %vm1255_vm15, %v1254_v5, %v1249_v14  ;;  %v988_v16 = vpop.xlane.xlu0 %987  ;;  %1923 = vmatpush3.bf16.msra.mxu1 %v2013_v22 }
 0x201   : > { %v1338_v19 = vrot.slane %v988_v16, %v2908_v57  ;;  %v1036_v6 = vpop.xlane.xlu1 %1035  ;;  %v1263_v29 = vsel %vm1262_vm0, %v1261_v13, %v1256_v12  ;;  %1924 = vmatprep.subr.bf16.mxu1 %v2256_v1 }
 0x202   : > { %v1417_v26 = vrot.slane %v1036_v6, %v2908_v57  ;;  %v1270_v42 = vsel %vm1269_vm1, %v1268_v7, %v1263_v29 }
 0x203   : > { %v1339_v35 = vsel %vm1255_vm15, %v1338_v19, %v1334_v41 }
 0x204   : > { %v1344_v38 = vsel %vm1262_vm0, %v1343_v40, %v1339_v35  ;;  %v1418_v43 = vsel %vm1255_vm15, %v1417_v26, %v1413_v33  ;;  %v1084_v45 = vpop.xlane.xlu0 %1083  ;;  %1925 = vmatpush3.bf16.msra.mxu1 %v2014_v25 }
 0x205   : > { %v1423_v49 = vsel %vm1262_vm0, %v1422_v63, %v1418_v43  ;;  %v1496_v52 = vrot.slane %v1084_v45, %v2908_v57  ;;  %v1090_v47 = vpop.xlane.xlu1 %1089  ;;  %v1349_v62 = vsel %vm1269_vm1, %v1348_v37, %v1344_v38  ;;  %1926 = vmatprep.subr.bf16.mxu1 %v2256_v1 }
 0x206   : > { %v1506_v18 = vrot.slane %v1090_v47, %v2902_v55  ;;  %v1428_v24 = vsel %vm1269_vm1, %v1427_v23, %v1423_v49  ;;  %v1509_v2 = vsel %vm1508_vm2, %v1349_v62, %v1270_v42 }
 0x207   : > { %v1497_v60 = vsel %vm1255_vm15, %v1496_v52, %v1492_v56  ;;  %v1511_v21 = vsel %vm1510_vm3, %v1428_v24, %v1509_v2 }
 0x208   : > { %v1502_v57 = vsel %vm1262_vm0, %v1501_v39, %v1497_v60  ;;  %1927 = vmatpush3.bf16.msra.mxu1 %v2015_v54 }
 0x209   : > { %v1507_v36 = vsel %vm1269_vm1, %v1506_v18, %v1502_v57 }
 0x20a   : > { %v1513_v0 = vsel %vm1512_vm4, %v1507_v36, %v1511_v21 }
 0x20c   : > { %v1096_v51 = vpop.permute.xlu0 %1095 }
 0x20d   : > { %vm1097_vm6 = vcmp.lt.s32.totalorder %v2780_v46, %v1096_v51 }
 0x20e   : > { %v1515_v55 = vsel %vm1097_vm6, %v1513_v0, -1000000.0 }
 0x20f   : > { %v1517_v11 = vsel %vm1516_vm5, %v1515_v55, -inf }
 0x210   : > { %1518 = vmax.xlane.f32.xlu1 %v1517_v11 }
 0x299   : > { %v1519_v59 = vpop.xlane.xlu1 %1518 }
 0x29a   : > { %v1520_v10 = vsub.f32 %v1515_v55, %v1519_v59 }
 0x29c   : > { %v1521_v48 = vmul.f32 1.442695, %v1520_v10 }
 0x29e   : > { %2144 = vpow2.f32 %v1521_v48 }
 0x2ab   : > { %v2145_v46 = vpop.eup %2144 }
 0x2ac   : > { %v1523_v4 = vsel %vm1516_vm5, %v2145_v46, 0.0 }
 0x2ad   : > { %1524 = vadd.xlane.f32.xlu1 %v1523_v4 }
 0x336   : > { %v1525_v28 = vpop.xlane.xlu1 %1524 }
 0x337   : > { %2146 = vrcp.f32 %v1525_v28 }
 0x344   : > { %v2147_v53 = vpop.eup %2146 }
 0x345   : > { %v1527_v44 = vmul.f32 %v2147_v53, %v1525_v28 }
 0x347   : > { %v1528_v61 = vsub.f32 2.0, %v1527_v44 }
 0x349   : > { %v1529_v58 = vmul.f32 %v2147_v53, %v1528_v61 }
 0x34b   : > { %v1530_v50 = vmul.f32 %v2145_v46, %v1529_v58 }
 0x34d   : > { %v1532_v5 = vpack.c.bf16 %v1530_v50, %v1530_v50  ;;  %1531 = vst [vmem:[%s382_s21] sm:$0xf] %v1530_v50 }
 0x34f   : > { %1929 = vmatmul.mubr.bf16.vlgmr.msra.gmra.mxu1 %v1532_v5 }
 0x350   : > { %2161 = shalt.err (!%p2158_p5)
}
 0x351   : > { %s2162_s0 = scalar_lea.hbm %s1670_s26, 64  ;;  %s2166_s24 = scalar_lea.hbm %s3087_s8, 128 }
 0x352   : > { %p2163_p6 = scmp.ne.s32.totalorder %s1670_s26, %s2162_s0  ;;  %p2167_p10 = scmp.lt.s32.totalorder %s1670_s26, %s3087_s8 }
 0x353   : > { %p2168_p11 = scmp.lt.s32.totalorder %s2166_s24, %s2162_s0 }
 0x354   : > { %p2164_p7 = pnand %p2163_p6, %p2347_p4 }
 0x355   : > { %p2169_p12 = por %p2168_p11, %p2167_p10 }
 0x356   : > { %p2165_p9 = pneg %p2164_p7 }
 0x358   : > { %p2170_p13 = pnand %p2169_p12, %p2165_p9 }
 0x35a   : > { %2173 = shalt.err (!%p2170_p13)
}
 0x35b   : > { %1933 = dma.vmem_to_hbm [thread:$0]  (%p2347_p4), %s1673_s11, 64, %s1670_s26, %s1644_s12  }
 0x35c   : > { %s3096_s20 = sshll.u32 %s3001_s25, 2  ;;  %s3097_s19 = sshll.u32 %s2246_s30, 6 }
 0x35d   : > { %s375_s14 = scalar_lea.vmem [#allocation2], %s3096_s20  ;;  %s3034_s0 = scalar_lea.hbm %s3086_s7, %s3097_s19 }
 0x35e   : > { %s1658_s16 = sshll.u32 %s375_s14, 4  ;;  %s1639_s22 = scalar_lea.sflag [#allocation3], %s3001_s25  ;;  %s3027_s16 = int_to_ptr.vmem [resolvable:$true] %s1658_s16 }
 0x35f   : > { %s2174_s23 = scalar_lea.vmem %s3027_s16, 64  ;;  %s2261_s26 = smov [#allocation2]  }
 0x360   : > { %p2175_p0 = scmp.ne.s32.totalorder %s3027_s16, %s2174_s23  ;;  %s2178_s11 = sshll.u32 %s2261_s26, 4  ;;  %s2179_s11 = int_to_ptr.vmem [resolvable:$false] %s2178_s11 }
 0x361   : > { %s2180_s30 = scalar_lea.vmem %s2179_s11, 128  ;;  %p2181_p3 = scmp.lt.s32.totalorder %s3027_s16, %s2179_s11 }
 0x362   : > { %p2176_p1 = pnand %p2175_p0, %p2347_p4  ;;  %p2182_p5 = scmp.lt.s32.totalorder %s2180_s30, %s2174_s23 }
 0x364   : > { %p2177_p2 = pneg %p2176_p1  ;;  %p2183_p6 = por %p2182_p5, %p2181_p3 }
 0x366   : > { %p2184_p7 = pnand %p2183_p6, %p2177_p2 }
 0x40f   : > { %v1631_v1 = vpop.f32.mrf.mxu1 }
 0x410   : > { %1637 = vst [vmem:[%s375_s14] sm:$0xf] %v1631_v1 }
 0x411   : > { %v1930_v3 = vpop.f32.mrf.mxu1 }
 0x412   : > { %2187 = shalt.err (!%p2184_p7)
}
 0x413   : > { %s2188_s12 = scalar_lea.hbm %s3034_s0, 64  ;;  %s2192_s20 = scalar_lea.hbm %s3086_s7, 128 }
 0x414   : > { %p2189_p9 = scmp.ne.s32.totalorder %s3034_s0, %s2188_s12  ;;  %p2193_p12 = scmp.lt.s32.totalorder %s3034_s0, %s3086_s7 }
 0x415   : > { %p2194_p13 = scmp.lt.s32.totalorder %s2192_s20, %s2188_s12 }
 0x416   : > { %p2190_p10 = pnand %p2189_p9, %p2347_p4 }
 0x417   : > { %p2195_p0 = por %p2194_p13, %p2193_p12 }
 0x418   : > { %p2191_p11 = pneg %p2190_p10 }
 0x41a   : > { %p2196_p1 = pnand %p2195_p0, %p2191_p11 }
 0x41c   : > { %2199 = shalt.err (!%p2196_p1)
}
 0x41d   : > { %1932 = dma.vmem_to_hbm [thread:$0]  (%p2347_p4), %s3027_s16, 64, %s3034_s0, %s1639_s22   ;;  %v1634_v14 = vpop.f32.mrf.mxu1 }
 0x41f   : > { %v1931_v27 = vpop.f32.mrf.mxu1 }
 0x420 PF: > { %p1943_p2 = scmp.ge.s32.totalorder %s2254_s10, 2  ;;  %s1684_s21 = sand.u32 1, %s2234_s27  }
 0x421   : > { %s1685_s1 = scalar_lea.sflag [#allocation3], %s1684_s21 }
 0x422   : > { %p1937_p3 = pnand %p1943_p2, %p2354_p8 }
 0x424   : > { %p1938_p5 = pneg %p1937_p3 }
 0x426   : > { %2225 = dma.done.wait (%p1938_p5), %s1685_s1, 64  }
 0x427   : > { %2227 = vsyncadd (%p1938_p5), %s1685_s1, 4294967232  ;;  %s1694_s23 = scalar_lea.sflag [#allocation5], %s1684_s21 }
 0x428   : > { %2229 = dma.done.wait (%p1938_p5), %s1694_s23, 64  }
 0x429   : > { %2231 = vsyncadd (%p1938_p5), %s1694_s23, 4294967232  ;;  %s25_s10 = sadd.s32 1, %s2254_s10   ;;  %s3098_s27 = smov %s2238_s28 }
 0x42a   : > { %p22_p4 = scmp.ge.s32.totalorder %s25_s10, 4   ;;  %s3099_s28 = smov %s2242_s29 }
 0x42b   : > { %s3100_s29 = smov %s2360_s18  ;;  %s3101_s30 = smov %s2250_s9 }
 0x42c   : > { %s3102_s9 = smov %s3104_s13  ;;  %24 = sbr.rel (!%p22_p4) target bundleno = 9 (0x9), region = 109 }
 0x431   :  { %1699 = vsyncpa [#allocation3], 1 }
 0x432   :  { %1701 = vsyncpa [#allocation3 + $0x1], 1 }
 0x433   :  { %1702 = vsyncpa [#allocation5], 1 }
 0x434   :  { %1704 = vsyncpa [#allocation5 + $0x1], 1 }

</bundles_post_ra>
